<compile_context>
chip_gen: v6e
topology: v6e:2x2x1
jax: 0.10.0
libtpu: 0.0.40
codegen_flags: <defaults>
</compile_context>

<pallas_src>
import math
import jax
import jax.numpy as jnp
from jax import lax
from jax.experimental import pallas as pl
from jax.experimental.pallas import tpu as pltpu


NEG_INF = -10000.0     # matches the reference masked_fill(mask == 0, -10000)
LN_EPS = 1e-12         # matches the repo's custom LayerNorm eps


# ------------------------- in-kernel building blocks ------------------------

def _softmax_attention(q, k, v, bias, inv_sqrt_dh):
    """q:(Lq,dh), k/v:(Lk,dh), bias:(Lq,Lk) additive mask. Returns (Lq,dh)."""
    # contract last dims of both operands -> K is fed to the MXU untransposed
    score = lax.dot_general(q, k, (((1,), (1,)), ((), ())),
                            preferred_element_type=jnp.float32)
    score = score * inv_sqrt_dh + bias
    score = score - jnp.max(score, axis=-1, keepdims=True)
    p = jnp.exp(score)
    # EUP approx reciprocal instead of a VALU divide
    p = p * pl.reciprocal(jnp.sum(p, axis=-1, keepdims=True), approx=True)
    return jnp.dot(p, v, preferred_element_type=jnp.float32)


def _mha(q_all, k_all, v_all, wo, bo, bias, n_head, dh):
    """Multi-head attention + output projection.
    Head merge is folded into the projection:
      concat(heads) @ Wo == sum_h head_h @ Wo[h*dh:(h+1)*dh, :]
    so no concatenation / transposes are needed."""
    inv = 1.0 / math.sqrt(dh)
    acc = None
    for h in range(n_head):                 # static, n_head is tiny
        sl = slice(h * dh, (h + 1) * dh)
        o_h = _softmax_attention(q_all[:, sl], k_all[:, sl], v_all[:, sl],
                                 bias, inv)
        contrib = jnp.dot(o_h, wo[sl, :], preferred_element_type=jnp.float32)
        acc = contrib if acc is None else acc + contrib
    return acc + bo


def _add_layernorm(x, resid, gamma, beta):
    y = x + resid
    mean = jnp.mean(y, axis=-1, keepdims=True)
    var = jnp.mean((y - mean) ** 2, axis=-1, keepdims=True)   # unbiased=False
    return gamma * ((y - mean) * lax.rsqrt(var + LN_EPS)) + beta


def _ffn(x, w1, b1, w2, b2):
    h = jnp.maximum(
        jnp.dot(x, w1, preferred_element_type=jnp.float32) + b1, 0.0)
    return jnp.dot(h, w2, preferred_element_type=jnp.float32) + b2


# ----------------------------- fused layer kernels ---------------------------

def _make_encoder_layer_kernel(n_head, dh):
    D = n_head * dh

    def kernel(x_ref, bias_ref,
               wqkv_ref, bqkv_ref, wo_ref, bo_ref,
               g1_ref, be1_ref,
               w1_ref, bf1_ref, w2_ref, bf2_ref,
               g2_ref, be2_ref,
               o_ref):
        x = x_ref[0]                                   # (L, D)
        bias = bias_ref[0]                             # (L, L)
        # fused QKV projection: one (L,D) x (D,3D) GEMM
        qkv = jnp.dot(x, wqkv_ref[...],
                      preferred_element_type=jnp.float32) + bqkv_ref[...]
        attn = _mha(qkv[:, 0:D], qkv[:, D:2 * D], qkv[:, 2 * D:3 * D],
                    wo_ref[...], bo_ref[...], bias, n_head, dh)
        x1 = _add_layernorm(attn, x, g1_ref[...], be1_ref[...])
        ff = _ffn(x1, w1_ref[...], bf1_ref[...], w2_ref[...], bf2_ref[...])
        o_ref[0] = _add_layernorm(ff, x1, g2_ref[...], be2_ref[...])

    return kernel


def _make_decoder_layer_kernel(n_head, dh):
    D = n_head * dh

    def kernel(x_ref, enc_ref, tbias_ref, cbias_ref,
               wqkv_ref, bqkv_ref, wo1_ref, bo1_ref,
               wqc_ref, bqc_ref, wkvc_ref, bkvc_ref, wo2_ref, bo2_ref,
               g1_ref, be1_ref, g2_ref, be2_ref,
               w1_ref, bf1_ref, w2_ref, bf2_ref,
               g3_ref, be3_ref,
               o_ref):
        x = x_ref[0]                                   # (Lt, D)
        enc = enc_ref[0]                               # (Ls, D)
        # --- masked self-attention (fused QKV) ---
        qkv = jnp.dot(x, wqkv_ref[...],
                      preferred_element_type=jnp.float32) + bqkv_ref[...]
        a = _mha(qkv[:, 0:D], qkv[:, D:2 * D], qkv[:, 2 * D:3 * D],
                 wo1_ref[...], bo1_ref[...], tbias_ref[0], n_head, dh)
        x1 = _add_layernorm(a, x, g1_ref[...], be1_ref[...])
        # --- encoder-decoder cross attention (fused KV) ---
        qc = jnp.dot(x1, wqc_ref[...],
                     preferred_element_type=jnp.float32) + bqc_ref[...]
        kv = jnp.dot(enc, wkvc_ref[...],
                     preferred_element_type=jnp.float32) + bkvc_ref[...]
        a = _mha(qc, kv[:, 0:D], kv[:, D:2 * D],
                 wo2_ref[...], bo2_ref[...], cbias_ref[0], n_head, dh)
        x2 = _add_layernorm(a, x1, g2_ref[...], be2_ref[...])
        # --- position-wise FFN ---
        ff = _ffn(x2, w1_ref[...], bf1_ref[...], w2_ref[...], bf2_ref[...])
        o_ref[0] = _add_layernorm(ff, x2, g3_ref[...], be3_ref[...])

    return kernel


# ----------------------------- layer wrappers --------------------------------

def encoder_layer(x, bias, p, n_head):
    B, L, D = x.shape
    F = p["w1"].shape[1]
    rep = lambda shape: pl.BlockSpec(shape, lambda b: (0, 0))   # replicated
    return pl.pallas_call(
        _make_encoder_layer_kernel(n_head, D // n_head),
        out_shape=jax.ShapeDtypeStruct((B, L, D), jnp.float32),
        grid=(B,),
        in_specs=[
            pl.BlockSpec((1, L, D), lambda b: (b, 0, 0)),       # x
            pl.BlockSpec((1, L, L), lambda b: (b, 0, 0)),       # mask bias
            rep((D, 3 * D)), rep((1, 3 * D)),                   # wqkv, bqkv
            rep((D, D)), rep((1, D)),                           # wo, bo
            rep((1, D)), rep((1, D)),                           # ln1 g/b
            rep((D, F)), rep((1, F)),                           # ffn w1, b1
            rep((F, D)), rep((1, D)),                           # ffn w2, b2
            rep((1, D)), rep((1, D)),                           # ln2 g/b
        ],
        out_specs=pl.BlockSpec((1, L, D), lambda b: (b, 0, 0)),
        compiler_params=pltpu.CompilerParams(
            dimension_semantics=("parallel",)),                 # v7x: 2 TCs
    )(x, bias,
      p["wqkv"], p["bqkv"], p["wo"], p["bo"],
      p["g1"], p["be1"],
      p["w1"], p["bf1"], p["w2"], p["bf2"],
      p["g2"], p["be2"])


def decoder_layer(x, enc, tbias, cbias, p, n_head):
    B, Lt, D = x.shape
    Ls = enc.shape[1]
    F = p["w1"].shape[1]
    rep = lambda shape: pl.BlockSpec(shape, lambda b: (0, 0))
    return pl.pallas_call(
        _make_decoder_layer_kernel(n_head, D // n_head),
        out_shape=jax.ShapeDtypeStruct((B, Lt, D), jnp.float32),
        grid=(B,),
        in_specs=[
            pl.BlockSpec((1, Lt, D), lambda b: (b, 0, 0)),      # x
            pl.BlockSpec((1, Ls, D), lambda b: (b, 0, 0)),      # enc_src
            pl.BlockSpec((1, Lt, Lt), lambda b: (b, 0, 0)),     # trg mask bias
            pl.BlockSpec((1, Lt, Ls), lambda b: (b, 0, 0)),     # src mask bias
            rep((D, 3 * D)), rep((1, 3 * D)), rep((D, D)), rep((1, D)),
            rep((D, D)), rep((1, D)), rep((D, 2 * D)), rep((1, 2 * D)),
            rep((D, D)), rep((1, D)),
            rep((1, D)), rep((1, D)), rep((1, D)), rep((1, D)),
            rep((D, F)), rep((1, F)), rep((F, D)), rep((1, D)),
            rep((1, D)), rep((1, D)),
        ],
        out_specs=pl.BlockSpec((1, Lt, D), lambda b: (b, 0, 0)),
        compiler_params=pltpu.CompilerParams(
            dimension_semantics=("parallel",)),
    )(x, enc, tbias, cbias,
      p["wqkv"], p["bqkv"], p["wo1"], p["bo1"],
      p["wqc"], p["bqc"], p["wkvc"], p["bkvc"], p["wo2"], p["bo2"],
      p["g1"], p["be1"], p["g2"], p["be2"],
      p["w1"], p["bf1"], p["w2"], p["bf2"],
      p["g3"], p["be3"])


# ----------------------------- final projection ------------------------------

def _dense_kernel(x_ref, w_ref, b_ref, o_ref):
    o_ref[...] = (jnp.dot(x_ref[...], w_ref[...],
                          preferred_element_type=jnp.float32) + b_ref[...])


def dense(x, w, b):
    """x: (M, K), w: (K, N), b: (1, N) -> (M, N). Whole-array blocks (toy size).
    TODO(synk): tile M/N in 128-multiples (+ f32 VMEM accumulator, parallel
    semantics) for real vocab sizes; sized for v7x VMEM first."""
    M, K = x.shape
    N = w.shape[1]
    return pl.pallas_call(
        _dense_kernel,
        out_shape=jax.ShapeDtypeStruct((M, N), jnp.float32),
        grid=(1,),
        in_specs=[pl.BlockSpec((M, K), lambda i: (0, 0)),
                  pl.BlockSpec((K, N), lambda i: (0, 0)),
                  pl.BlockSpec((1, N), lambda i: (0, 0))],
        out_specs=pl.BlockSpec((M, N), lambda i: (0, 0)),
        compiler_params=pltpu.CompilerParams(
            dimension_semantics=("arbitrary",)),
    )(x, w, b)


# ----------------------------- plain-JAX glue --------------------------------

def sinusoid_table(max_len, d_model):
    pos = jnp.arange(max_len, dtype=jnp.float32)[:, None]
    i2 = jnp.arange(0, d_model, 2, dtype=jnp.float32)
    angle = pos / jnp.power(10000.0, i2 / d_model)
    enc = jnp.zeros((max_len, d_model), jnp.float32)
    enc = enc.at[:, 0::2].set(jnp.sin(angle))
    enc = enc.at[:, 1::2].set(jnp.cos(angle))
    return enc


def embed(tokens, emb_table, pos_table):
    L = tokens.shape[1]
    tok = jnp.take(emb_table, tokens, axis=0)          # (B, L, D)
    return tok + pos_table[:L][None, :, :]


def transformer_forward(src, trg, params, cfg):
    n_head = cfg["n_head"]
    src_pad, trg_pad = cfg["src_pad_idx"], cfg["trg_pad_idx"]
    B, Ls = src.shape
    Lt = trg.shape[1]

    # masks as additive f32 biases, built once per forward (h-invariant).
    src_keep = (src != src_pad)                                       # (B, Ls)
    src_bias_row = jnp.where(src_keep[:, None, :],
                             jnp.float32(0.0), jnp.float32(NEG_INF))  # (B,1,Ls)
    enc_bias = jnp.broadcast_to(src_bias_row, (B, Ls, Ls))
    cross_bias = jnp.broadcast_to(src_bias_row, (B, Lt, Ls))
    trg_keep = (trg != trg_pad)[:, :, None]                           # (B,Lt,1)
    causal = jnp.tril(jnp.ones((Lt, Lt), jnp.bool_))[None]
    trg_bias = jnp.where(jnp.logical_and(trg_keep, causal),
                         jnp.float32(0.0), jnp.float32(NEG_INF))      # (B,Lt,Lt)

    # encoder: one fused pallas_call per layer
    x = embed(src, params["enc_emb"], params["pos"])
    for lp in params["enc_layers"]:
        x = encoder_layer(x, enc_bias, lp, n_head)
    enc_src = x

    # decoder: one fused pallas_call per layer
    y = embed(trg, params["dec_emb"], params["pos"])
    for lp in params["dec_layers"]:
        y = decoder_layer(y, enc_src, trg_bias, cross_bias, lp, n_head)

    D = y.shape[-1]
    logits = dense(y.reshape(-1, D), params["out_w"], params["out_b"])
    return logits.reshape(B, Lt, -1)


# ----------------------------- parameter init --------------------------------

def init_params(key, cfg):
    d, f = cfg["d_model"], cfg["ffn_hidden"]
    scale = 0.02
    keys = iter(jax.random.split(key, 4096))

    def w(din, dout):
        return jax.random.normal(next(keys), (din, dout), jnp.float32) * scale

    def zeros(n):
        return jnp.zeros((1, n), jnp.float32)

    def ones(n):
        return jnp.ones((1, n), jnp.float32)

    def enc_layer():
        return dict(
            wqkv=w(d, 3 * d), bqkv=zeros(3 * d),      # fused Wq|Wk|Wv
            wo=w(d, d), bo=zeros(d),
            g1=ones(d), be1=zeros(d),
            w1=w(d, f), bf1=zeros(f), w2=w(f, d), bf2=zeros(d),
            g2=ones(d), be2=zeros(d))

    def dec_layer():
        return dict(
            wqkv=w(d, 3 * d), bqkv=zeros(3 * d),      # fused self-attn QKV
            wo1=w(d, d), bo1=zeros(d),
            wqc=w(d, d), bqc=zeros(d),
            wkvc=w(d, 2 * d), bkvc=zeros(2 * d),      # fused cross-attn K|V
            wo2=w(d, d), bo2=zeros(d),
            g1=ones(d), be1=zeros(d),
            g2=ones(d), be2=zeros(d),
            w1=w(d, f), bf1=zeros(f), w2=w(f, d), bf2=zeros(d),
            g3=ones(d), be3=zeros(d))

    enc_emb = jax.random.normal(next(keys), (cfg["enc_voc_size"], d)) * scale
    dec_emb = jax.random.normal(next(keys), (cfg["dec_voc_size"], d)) * scale
    # nn.Embedding(padding_idx=1) zeros that row
    enc_emb = enc_emb.at[1].set(0.0)
    dec_emb = dec_emb.at[1].set(0.0)

    return dict(
        enc_emb=enc_emb.astype(jnp.float32),
        dec_emb=dec_emb.astype(jnp.float32),
        pos=sinusoid_table(cfg["max_len"], d),
        enc_layers=[enc_layer() for _ in range(cfg["n_layers"])],
        dec_layers=[dec_layer() for _ in range(cfg["n_layers"])],
        out_w=w(d, cfg["dec_voc_size"]),
        out_b=zeros(cfg["dec_voc_size"]),
    )


# --------------------------------- main ---------------------------------------

if __name__ == "__main__":
    cfg = dict(src_pad_idx=1, trg_pad_idx=1, trg_sos_idx=2,
               enc_voc_size=16, dec_voc_size=16,
               d_model=32, n_head=4, max_len=16,
               ffn_hidden=64, n_layers=2, drop_prob=0.0)

    key = jax.random.PRNGKey(0)
    kp, ks, kt = jax.random.split(key, 3)
    params = init_params(kp, cfg)

    B, Ls, Lt = 2, 8, 8
    src = jax.random.randint(ks, (B, Ls), 2, cfg["enc_voc_size"], dtype=jnp.int32)
    trg = jax.random.randint(kt, (B, Lt), 2, cfg["dec_voc_size"], dtype=jnp.int32)
    # a few pad tokens to exercise the masks
    src = src.at[:, -1].set(cfg["src_pad_idx"])
    trg = trg.at[:, -1].set(cfg["trg_pad_idx"])

    out = transformer_forward(src, trg, params, cfg)
    out = jax.block_until_ready(out)
    assert out.shape == (B, Lt, cfg["dec_voc_size"])
    assert bool(jnp.all(jnp.isfinite(out)))
    print("KERNEL_OK")
</pallas_src>

<mosaic_0001>
module attributes {stable_mosaic.version = 11 : i64} {
  func.func @kernel(%arg0: i32, %arg1: memref<1x8x32xf32, #tpu.memory_space<vmem>>, %arg2: memref<1x8x8xf32, #tpu.memory_space<vmem>>, %arg3: memref<32x96xf32, #tpu.memory_space<vmem>>, %arg4: memref<1x96xf32, #tpu.memory_space<vmem>>, %arg5: memref<32x32xf32, #tpu.memory_space<vmem>>, %arg6: memref<1x32xf32, #tpu.memory_space<vmem>>, %arg7: memref<1x32xf32, #tpu.memory_space<vmem>>, %arg8: memref<1x32xf32, #tpu.memory_space<vmem>>, %arg9: memref<32x64xf32, #tpu.memory_space<vmem>>, %arg10: memref<1x64xf32, #tpu.memory_space<vmem>>, %arg11: memref<64x32xf32, #tpu.memory_space<vmem>>, %arg12: memref<1x32xf32, #tpu.memory_space<vmem>>, %arg13: memref<1x32xf32, #tpu.memory_space<vmem>>, %arg14: memref<1x32xf32, #tpu.memory_space<vmem>>, %arg15: memref<1x8x32xf32, #tpu.memory_space<vmem>>) attributes {dimension_semantics = [#tpu.dimension_semantics<parallel>], iteration_bounds = array<i64: 2>, scalar_prefetch = 0 : i64, scratch_operands = 0 : i64, tpu.core_type = #tpu.core_type<tc>, window_params = [{transform_indices = @transform_0, window_bounds = array<i64: 1, 8, 32>}, {transform_indices = @transform_1, window_bounds = array<i64: 1, 8, 8>}, {pipeline_mode = #tpu.pipeline_mode<synchronous>, transform_indices = @transform_2, window_bounds = array<i64: 32, 96>}, {pipeline_mode = #tpu.pipeline_mode<synchronous>, transform_indices = @transform_3, window_bounds = array<i64: 1, 96>}, {pipeline_mode = #tpu.pipeline_mode<synchronous>, transform_indices = @transform_4, window_bounds = array<i64: 32, 32>}, {pipeline_mode = #tpu.pipeline_mode<synchronous>, transform_indices = @transform_5, window_bounds = array<i64: 1, 32>}, {pipeline_mode = #tpu.pipeline_mode<synchronous>, transform_indices = @transform_6, window_bounds = array<i64: 1, 32>}, {pipeline_mode = #tpu.pipeline_mode<synchronous>, transform_indices = @transform_7, window_bounds = array<i64: 1, 32>}, {pipeline_mode = #tpu.pipeline_mode<synchronous>, transform_indices = @transform_8, window_bounds = array<i64: 32, 64>}, {pipeline_mode = #tpu.pipeline_mode<synchronous>, transform_indices = @transform_9, window_bounds = array<i64: 1, 64>}, {pipeline_mode = #tpu.pipeline_mode<synchronous>, transform_indices = @transform_10, window_bounds = array<i64: 64, 32>}, {pipeline_mode = #tpu.pipeline_mode<synchronous>, transform_indices = @transform_11, window_bounds = array<i64: 1, 32>}, {pipeline_mode = #tpu.pipeline_mode<synchronous>, transform_indices = @transform_12, window_bounds = array<i64: 1, 32>}, {pipeline_mode = #tpu.pipeline_mode<synchronous>, transform_indices = @transform_13, window_bounds = array<i64: 1, 32>}, {transform_indices = @transform_14, window_bounds = array<i64: 1, 8, 32>}]} {
    %c0 = arith.constant 0 : index
    %c0_0 = arith.constant 0 : index
    %c0_1 = arith.constant 0 : index
    %0 = vector.load %arg1[%c0, %c0_0, %c0_1] : memref<1x8x32xf32, #tpu.memory_space<vmem>>, vector<1x8x32xf32>
    %1 = vector.shape_cast %0 : vector<1x8x32xf32> to vector<8x32xf32>
    %c0_2 = arith.constant 0 : index
    %c0_3 = arith.constant 0 : index
    %c0_4 = arith.constant 0 : index
    %2 = vector.load %arg2[%c0_2, %c0_3, %c0_4] : memref<1x8x8xf32, #tpu.memory_space<vmem>>, vector<1x8x8xf32>
    %3 = vector.shape_cast %2 : vector<1x8x8xf32> to vector<8x8xf32>
    %c0_5 = arith.constant 0 : index
    %c0_6 = arith.constant 0 : index
    %4 = vector.load %arg3[%c0_5, %c0_6] : memref<32x96xf32, #tpu.memory_space<vmem>>, vector<32x96xf32>
    %cst = arith.constant dense<0.000000e+00> : vector<8x96xf32>
    %5 = tpu.matmul %1, %4, %cst {dimension_numbers = #tpu.dot_dimension_numbers<[1], [0], [0], [1], [0, 0, 1, 1], [], []>} : vector<8x32xf32>, vector<32x96xf32>, vector<8x96xf32> -> vector<8x96xf32>
    %c0_7 = arith.constant 0 : index
    %c0_8 = arith.constant 0 : index
    %6 = vector.load %arg4[%c0_7, %c0_8] : memref<1x96xf32, #tpu.memory_space<vmem>>, vector<1x96xf32>
    %7 = vector.broadcast %6 : vector<1x96xf32> to vector<8x96xf32>
    %8 = arith.addf %5, %7 : vector<8x96xf32>
    %9 = vector.extract_strided_slice %8 {offsets = [0, 0], sizes = [8, 32], strides = [1, 1]} : vector<8x96xf32> to vector<8x32xf32>
    %10 = vector.extract_strided_slice %8 {offsets = [0, 32], sizes = [8, 32], strides = [1, 1]} : vector<8x96xf32> to vector<8x32xf32>
    %11 = vector.extract_strided_slice %8 {offsets = [0, 64], sizes = [8, 32], strides = [1, 1]} : vector<8x96xf32> to vector<8x32xf32>
    %c0_9 = arith.constant 0 : index
    %c0_10 = arith.constant 0 : index
    %12 = vector.load %arg5[%c0_9, %c0_10] : memref<32x32xf32, #tpu.memory_space<vmem>>, vector<32x32xf32>
    %c0_11 = arith.constant 0 : index
    %c0_12 = arith.constant 0 : index
    %13 = vector.load %arg6[%c0_11, %c0_12] : memref<1x32xf32, #tpu.memory_space<vmem>>, vector<1x32xf32>
    %14 = vector.extract_strided_slice %9 {offsets = [0, 0], sizes = [8, 8], strides = [1, 1]} : vector<8x32xf32> to vector<8x8xf32>
    %15 = vector.extract_strided_slice %10 {offsets = [0, 0], sizes = [8, 8], strides = [1, 1]} : vector<8x32xf32> to vector<8x8xf32>
    %16 = vector.extract_strided_slice %11 {offsets = [0, 0], sizes = [8, 8], strides = [1, 1]} : vector<8x32xf32> to vector<8x8xf32>
    %cst_13 = arith.constant dense<0.000000e+00> : vector<8x8xf32>
    %17 = tpu.matmul %14, %15, %cst_13 {dimension_numbers = #tpu.dot_dimension_numbers<[1], [1], [0], [0], [0, 0, 1, 0], [], []>} : vector<8x8xf32>, vector<8x8xf32>, vector<8x8xf32> -> vector<8x8xf32>
    %cst_14 = arith.constant 0.353553385 : f32
    %18 = vector.broadcast %cst_14 : f32 to vector<8x8xf32>
    %19 = arith.mulf %17, %18 : vector<8x8xf32>
    %20 = arith.addf %19, %3 : vector<8x8xf32>
    %cst_15 = arith.constant dense<0xFF800000> : vector<8xf32>
    %21 = vector.multi_reduction <maximumf>, %20, %cst_15 [1] : vector<8x8xf32> to vector<8xf32>
    %22 = vector.shape_cast %21 : vector<8xf32> to vector<8x1xf32>
    %23 = vector.broadcast %22 : vector<8x1xf32> to vector<8x8xf32>
    %24 = arith.subf %20, %23 : vector<8x8xf32>
    %25 = math.exp %24 : vector<8x8xf32>
    %cst_16 = arith.constant dense<0.000000e+00> : vector<8xf32>
    %26 = vector.multi_reduction <add>, %25, %cst_16 [1] : vector<8x8xf32> to vector<8xf32>
    %27 = vector.shape_cast %26 : vector<8xf32> to vector<8x1xf32>
    %28 = tpu.reciprocal %27 {approx = true} : vector<8x1xf32> -> vector<8x1xf32>
    %29 = vector.broadcast %28 : vector<8x1xf32> to vector<8x8xf32>
    %30 = arith.mulf %25, %29 : vector<8x8xf32>
    %cst_17 = arith.constant dense<0.000000e+00> : vector<8x8xf32>
    %31 = tpu.matmul %30, %16, %cst_17 {dimension_numbers = #tpu.dot_dimension_numbers<[1], [0], [0], [1], [0, 0, 1, 1], [], []>} : vector<8x8xf32>, vector<8x8xf32>, vector<8x8xf32> -> vector<8x8xf32>
    %32 = vector.extract_strided_slice %12 {offsets = [0, 0], sizes = [8, 32], strides = [1, 1]} : vector<32x32xf32> to vector<8x32xf32>
    %cst_18 = arith.constant dense<0.000000e+00> : vector<8x32xf32>
    %33 = tpu.matmul %31, %32, %cst_18 {dimension_numbers = #tpu.dot_dimension_numbers<[1], [0], [0], [1], [0, 0, 1, 1], [], []>} : vector<8x8xf32>, vector<8x32xf32>, vector<8x32xf32> -> vector<8x32xf32>
    %34 = vector.extract_strided_slice %9 {offsets = [0, 8], sizes = [8, 8], strides = [1, 1]} : vector<8x32xf32> to vector<8x8xf32>
    %35 = vector.extract_strided_slice %10 {offsets = [0, 8], sizes = [8, 8], strides = [1, 1]} : vector<8x32xf32> to vector<8x8xf32>
    %36 = vector.extract_strided_slice %11 {offsets = [0, 8], sizes = [8, 8], strides = [1, 1]} : vector<8x32xf32> to vector<8x8xf32>
    %cst_19 = arith.constant dense<0.000000e+00> : vector<8x8xf32>
    %37 = tpu.matmul %34, %35, %cst_19 {dimension_numbers = #tpu.dot_dimension_numbers<[1], [1], [0], [0], [0, 0, 1, 0], [], []>} : vector<8x8xf32>, vector<8x8xf32>, vector<8x8xf32> -> vector<8x8xf32>
    %cst_20 = arith.constant 0.353553385 : f32
    %38 = vector.broadcast %cst_20 : f32 to vector<8x8xf32>
    %39 = arith.mulf %37, %38 : vector<8x8xf32>
    %40 = arith.addf %39, %3 : vector<8x8xf32>
    %cst_21 = arith.constant dense<0xFF800000> : vector<8xf32>
    %41 = vector.multi_reduction <maximumf>, %40, %cst_21 [1] : vector<8x8xf32> to vector<8xf32>
    %42 = vector.shape_cast %41 : vector<8xf32> to vector<8x1xf32>
    %43 = vector.broadcast %42 : vector<8x1xf32> to vector<8x8xf32>
    %44 = arith.subf %40, %43 : vector<8x8xf32>
    %45 = math.exp %44 : vector<8x8xf32>
    %cst_22 = arith.constant dense<0.000000e+00> : vector<8xf32>
    %46 = vector.multi_reduction <add>, %45, %cst_22 [1] : vector<8x8xf32> to vector<8xf32>
    %47 = vector.shape_cast %46 : vector<8xf32> to vector<8x1xf32>
    %48 = tpu.reciprocal %47 {approx = true} : vector<8x1xf32> -> vector<8x1xf32>
    %49 = vector.broadcast %48 : vector<8x1xf32> to vector<8x8xf32>
    %50 = arith.mulf %45, %49 : vector<8x8xf32>
    %cst_23 = arith.constant dense<0.000000e+00> : vector<8x8xf32>
    %51 = tpu.matmul %50, %36, %cst_23 {dimension_numbers = #tpu.dot_dimension_numbers<[1], [0], [0], [1], [0, 0, 1, 1], [], []>} : vector<8x8xf32>, vector<8x8xf32>, vector<8x8xf32> -> vector<8x8xf32>
    %52 = vector.extract_strided_slice %12 {offsets = [8, 0], sizes = [8, 32], strides = [1, 1]} : vector<32x32xf32> to vector<8x32xf32>
    %cst_24 = arith.constant dense<0.000000e+00> : vector<8x32xf32>
    %53 = tpu.matmul %51, %52, %cst_24 {dimension_numbers = #tpu.dot_dimension_numbers<[1], [0], [0], [1], [0, 0, 1, 1], [], []>} : vector<8x8xf32>, vector<8x32xf32>, vector<8x32xf32> -> vector<8x32xf32>
    %54 = arith.addf %33, %53 : vector<8x32xf32>
    %55 = vector.extract_strided_slice %9 {offsets = [0, 16], sizes = [8, 8], strides = [1, 1]} : vector<8x32xf32> to vector<8x8xf32>
    %56 = vector.extract_strided_slice %10 {offsets = [0, 16], sizes = [8, 8], strides = [1, 1]} : vector<8x32xf32> to vector<8x8xf32>
    %57 = vector.extract_strided_slice %11 {offsets = [0, 16], sizes = [8, 8], strides = [1, 1]} : vector<8x32xf32> to vector<8x8xf32>
    %cst_25 = arith.constant dense<0.000000e+00> : vector<8x8xf32>
    %58 = tpu.matmul %55, %56, %cst_25 {dimension_numbers = #tpu.dot_dimension_numbers<[1], [1], [0], [0], [0, 0, 1, 0], [], []>} : vector<8x8xf32>, vector<8x8xf32>, vector<8x8xf32> -> vector<8x8xf32>
    %cst_26 = arith.constant 0.353553385 : f32
    %59 = vector.broadcast %cst_26 : f32 to vector<8x8xf32>
    %60 = arith.mulf %58, %59 : vector<8x8xf32>
    %61 = arith.addf %60, %3 : vector<8x8xf32>
    %cst_27 = arith.constant dense<0xFF800000> : vector<8xf32>
    %62 = vector.multi_reduction <maximumf>, %61, %cst_27 [1] : vector<8x8xf32> to vector<8xf32>
    %63 = vector.shape_cast %62 : vector<8xf32> to vector<8x1xf32>
    %64 = vector.broadcast %63 : vector<8x1xf32> to vector<8x8xf32>
    %65 = arith.subf %61, %64 : vector<8x8xf32>
    %66 = math.exp %65 : vector<8x8xf32>
    %cst_28 = arith.constant dense<0.000000e+00> : vector<8xf32>
    %67 = vector.multi_reduction <add>, %66, %cst_28 [1] : vector<8x8xf32> to vector<8xf32>
    %68 = vector.shape_cast %67 : vector<8xf32> to vector<8x1xf32>
    %69 = tpu.reciprocal %68 {approx = true} : vector<8x1xf32> -> vector<8x1xf32>
    %70 = vector.broadcast %69 : vector<8x1xf32> to vector<8x8xf32>
    %71 = arith.mulf %66, %70 : vector<8x8xf32>
    %cst_29 = arith.constant dense<0.000000e+00> : vector<8x8xf32>
    %72 = tpu.matmul %71, %57, %cst_29 {dimension_numbers = #tpu.dot_dimension_numbers<[1], [0], [0], [1], [0, 0, 1, 1], [], []>} : vector<8x8xf32>, vector<8x8xf32>, vector<8x8xf32> -> vector<8x8xf32>
    %73 = vector.extract_strided_slice %12 {offsets = [16, 0], sizes = [8, 32], strides = [1, 1]} : vector<32x32xf32> to vector<8x32xf32>
    %cst_30 = arith.constant dense<0.000000e+00> : vector<8x32xf32>
    %74 = tpu.matmul %72, %73, %cst_30 {dimension_numbers = #tpu.dot_dimension_numbers<[1], [0], [0], [1], [0, 0, 1, 1], [], []>} : vector<8x8xf32>, vector<8x32xf32>, vector<8x32xf32> -> vector<8x32xf32>
    %75 = arith.addf %54, %74 : vector<8x32xf32>
    %76 = vector.extract_strided_slice %9 {offsets = [0, 24], sizes = [8, 8], strides = [1, 1]} : vector<8x32xf32> to vector<8x8xf32>
    %77 = vector.extract_strided_slice %10 {offsets = [0, 24], sizes = [8, 8], strides = [1, 1]} : vector<8x32xf32> to vector<8x8xf32>
    %78 = vector.extract_strided_slice %11 {offsets = [0, 24], sizes = [8, 8], strides = [1, 1]} : vector<8x32xf32> to vector<8x8xf32>
    %cst_31 = arith.constant dense<0.000000e+00> : vector<8x8xf32>
    %79 = tpu.matmul %76, %77, %cst_31 {dimension_numbers = #tpu.dot_dimension_numbers<[1], [1], [0], [0], [0, 0, 1, 0], [], []>} : vector<8x8xf32>, vector<8x8xf32>, vector<8x8xf32> -> vector<8x8xf32>
    %cst_32 = arith.constant 0.353553385 : f32
    %80 = vector.broadcast %cst_32 : f32 to vector<8x8xf32>
    %81 = arith.mulf %79, %80 : vector<8x8xf32>
    %82 = arith.addf %81, %3 : vector<8x8xf32>
    %cst_33 = arith.constant dense<0xFF800000> : vector<8xf32>
    %83 = vector.multi_reduction <maximumf>, %82, %cst_33 [1] : vector<8x8xf32> to vector<8xf32>
    %84 = vector.shape_cast %83 : vector<8xf32> to vector<8x1xf32>
    %85 = vector.broadcast %84 : vector<8x1xf32> to vector<8x8xf32>
    %86 = arith.subf %82, %85 : vector<8x8xf32>
    %87 = math.exp %86 : vector<8x8xf32>
    %cst_34 = arith.constant dense<0.000000e+00> : vector<8xf32>
    %88 = vector.multi_reduction <add>, %87, %cst_34 [1] : vector<8x8xf32> to vector<8xf32>
    %89 = vector.shape_cast %88 : vector<8xf32> to vector<8x1xf32>
    %90 = tpu.reciprocal %89 {approx = true} : vector<8x1xf32> -> vector<8x1xf32>
    %91 = vector.broadcast %90 : vector<8x1xf32> to vector<8x8xf32>
    %92 = arith.mulf %87, %91 : vector<8x8xf32>
    %cst_35 = arith.constant dense<0.000000e+00> : vector<8x8xf32>
    %93 = tpu.matmul %92, %78, %cst_35 {dimension_numbers = #tpu.dot_dimension_numbers<[1], [0], [0], [1], [0, 0, 1, 1], [], []>} : vector<8x8xf32>, vector<8x8xf32>, vector<8x8xf32> -> vector<8x8xf32>
    %94 = vector.extract_strided_slice %12 {offsets = [24, 0], sizes = [8, 32], strides = [1, 1]} : vector<32x32xf32> to vector<8x32xf32>
    %cst_36 = arith.constant dense<0.000000e+00> : vector<8x32xf32>
    %95 = tpu.matmul %93, %94, %cst_36 {dimension_numbers = #tpu.dot_dimension_numbers<[1], [0], [0], [1], [0, 0, 1, 1], [], []>} : vector<8x8xf32>, vector<8x32xf32>, vector<8x32xf32> -> vector<8x32xf32>
    %96 = arith.addf %75, %95 : vector<8x32xf32>
    %97 = vector.broadcast %13 : vector<1x32xf32> to vector<8x32xf32>
    %98 = arith.addf %96, %97 : vector<8x32xf32>
    %c0_37 = arith.constant 0 : index
    %c0_38 = arith.constant 0 : index
    %99 = vector.load %arg7[%c0_37, %c0_38] : memref<1x32xf32, #tpu.memory_space<vmem>>, vector<1x32xf32>
    %c0_39 = arith.constant 0 : index
    %c0_40 = arith.constant 0 : index
    %100 = vector.load %arg8[%c0_39, %c0_40] : memref<1x32xf32, #tpu.memory_space<vmem>>, vector<1x32xf32>
    %101 = arith.addf %98, %1 : vector<8x32xf32>
    %cst_41 = arith.constant dense<0.000000e+00> : vector<8xf32>
    %102 = vector.multi_reduction <add>, %101, %cst_41 [1] : vector<8x32xf32> to vector<8xf32>
    %103 = vector.shape_cast %102 : vector<8xf32> to vector<8x1xf32>
    %cst_42 = arith.constant 3.200000e+01 : f32
    %104 = vector.broadcast %cst_42 : f32 to vector<8x1xf32>
    %105 = arith.divf %103, %104 : vector<8x1xf32>
    %106 = vector.broadcast %105 : vector<8x1xf32> to vector<8x32xf32>
    %107 = arith.subf %101, %106 : vector<8x32xf32>
    %108 = arith.mulf %107, %107 : vector<8x32xf32>
    %cst_43 = arith.constant dense<0.000000e+00> : vector<8xf32>
    %109 = vector.multi_reduction <add>, %108, %cst_43 [1] : vector<8x32xf32> to vector<8xf32>
    %110 = vector.shape_cast %109 : vector<8xf32> to vector<8x1xf32>
    %cst_44 = arith.constant 3.200000e+01 : f32
    %111 = vector.broadcast %cst_44 : f32 to vector<8x1xf32>
    %112 = arith.divf %110, %111 : vector<8x1xf32>
    %113 = vector.broadcast %105 : vector<8x1xf32> to vector<8x32xf32>
    %114 = arith.subf %101, %113 : vector<8x32xf32>
    %cst_45 = arith.constant 9.99999996E-13 : f32
    %115 = vector.broadcast %cst_45 : f32 to vector<8x1xf32>
    %116 = arith.addf %112, %115 : vector<8x1xf32>
    %117 = math.rsqrt %116 : vector<8x1xf32>
    %118 = vector.broadcast %117 : vector<8x1xf32> to vector<8x32xf32>
    %119 = arith.mulf %114, %118 : vector<8x32xf32>
    %120 = vector.broadcast %99 : vector<1x32xf32> to vector<8x32xf32>
    %121 = arith.mulf %120, %119 : vector<8x32xf32>
    %122 = vector.broadcast %100 : vector<1x32xf32> to vector<8x32xf32>
    %123 = arith.addf %121, %122 : vector<8x32xf32>
    %c0_46 = arith.constant 0 : index
    %c0_47 = arith.constant 0 : index
    %124 = vector.load %arg9[%c0_46, %c0_47] : memref<32x64xf32, #tpu.memory_space<vmem>>, vector<32x64xf32>
    %c0_48 = arith.constant 0 : index
    %c0_49 = arith.constant 0 : index
    %125 = vector.load %arg10[%c0_48, %c0_49] : memref<1x64xf32, #tpu.memory_space<vmem>>, vector<1x64xf32>
    %c0_50 = arith.constant 0 : index
    %c0_51 = arith.constant 0 : index
    %126 = vector.load %arg11[%c0_50, %c0_51] : memref<64x32xf32, #tpu.memory_space<vmem>>, vector<64x32xf32>
    %c0_52 = arith.constant 0 : index
    %c0_53 = arith.constant 0 : index
    %127 = vector.load %arg12[%c0_52, %c0_53] : memref<1x32xf32, #tpu.memory_space<vmem>>, vector<1x32xf32>
    %cst_54 = arith.constant dense<0.000000e+00> : vector<8x64xf32>
    %128 = tpu.matmul %123, %124, %cst_54 {dimension_numbers = #tpu.dot_dimension_numbers<[1], [0], [0], [1], [0, 0, 1, 1], [], []>} : vector<8x32xf32>, vector<32x64xf32>, vector<8x64xf32> -> vector<8x64xf32>
    %129 = vector.broadcast %125 : vector<1x64xf32> to vector<8x64xf32>
    %130 = arith.addf %128, %129 : vector<8x64xf32>
    %cst_55 = arith.constant 0.000000e+00 : f32
    %131 = vector.broadcast %cst_55 : f32 to vector<8x64xf32>
    %132 = arith.maximumf %130, %131 : vector<8x64xf32>
    %cst_56 = arith.constant dense<0.000000e+00> : vector<8x32xf32>
    %133 = tpu.matmul %132, %126, %cst_56 {dimension_numbers = #tpu.dot_dimension_numbers<[1], [0], [0], [1], [0, 0, 1, 1], [], []>} : vector<8x64xf32>, vector<64x32xf32>, vector<8x32xf32> -> vector<8x32xf32>
    %134 = vector.broadcast %127 : vector<1x32xf32> to vector<8x32xf32>
    %135 = arith.addf %133, %134 : vector<8x32xf32>
    %c0_57 = arith.constant 0 : index
    %c0_58 = arith.constant 0 : index
    %136 = vector.load %arg13[%c0_57, %c0_58] : memref<1x32xf32, #tpu.memory_space<vmem>>, vector<1x32xf32>
    %c0_59 = arith.constant 0 : index
    %c0_60 = arith.constant 0 : index
    %137 = vector.load %arg14[%c0_59, %c0_60] : memref<1x32xf32, #tpu.memory_space<vmem>>, vector<1x32xf32>
    %138 = arith.addf %135, %123 : vector<8x32xf32>
    %cst_61 = arith.constant dense<0.000000e+00> : vector<8xf32>
    %139 = vector.multi_reduction <add>, %138, %cst_61 [1] : vector<8x32xf32> to vector<8xf32>
    %140 = vector.shape_cast %139 : vector<8xf32> to vector<8x1xf32>
    %cst_62 = arith.constant 3.200000e+01 : f32
    %141 = vector.broadcast %cst_62 : f32 to vector<8x1xf32>
    %142 = arith.divf %140, %141 : vector<8x1xf32>
    %143 = vector.broadcast %142 : vector<8x1xf32> to vector<8x32xf32>
    %144 = arith.subf %138, %143 : vector<8x32xf32>
    %145 = arith.mulf %144, %144 : vector<8x32xf32>
    %cst_63 = arith.constant dense<0.000000e+00> : vector<8xf32>
    %146 = vector.multi_reduction <add>, %145, %cst_63 [1] : vector<8x32xf32> to vector<8xf32>
    %147 = vector.shape_cast %146 : vector<8xf32> to vector<8x1xf32>
    %cst_64 = arith.constant 3.200000e+01 : f32
    %148 = vector.broadcast %cst_64 : f32 to vector<8x1xf32>
    %149 = arith.divf %147, %148 : vector<8x1xf32>
    %150 = vector.broadcast %142 : vector<8x1xf32> to vector<8x32xf32>
    %151 = arith.subf %138, %150 : vector<8x32xf32>
    %cst_65 = arith.constant 9.99999996E-13 : f32
    %152 = vector.broadcast %cst_65 : f32 to vector<8x1xf32>
    %153 = arith.addf %149, %152 : vector<8x1xf32>
    %154 = math.rsqrt %153 : vector<8x1xf32>
    %155 = vector.broadcast %154 : vector<8x1xf32> to vector<8x32xf32>
    %156 = arith.mulf %151, %155 : vector<8x32xf32>
    %157 = vector.broadcast %136 : vector<1x32xf32> to vector<8x32xf32>
    %158 = arith.mulf %157, %156 : vector<8x32xf32>
    %159 = vector.broadcast %137 : vector<1x32xf32> to vector<8x32xf32>
    %160 = arith.addf %158, %159 : vector<8x32xf32>
    %c0_66 = arith.constant 0 : index
    %c0_67 = arith.constant 0 : index
    %c0_68 = arith.constant 0 : index
    %161 = vector.load %arg15[%c0_66, %c0_67, %c0_68] : memref<1x8x32xf32, #tpu.memory_space<vmem>>, vector<1x8x32xf32>
    %162 = vector.shape_cast %161 : vector<1x8x32xf32> to vector<8x32xf32>
    %163 = vector.shape_cast %160 : vector<8x32xf32> to vector<1x8x32xf32>
    tpu.vector_store %arg15[%c0_66, %c0_67, %c0_68], %163 {strides = array<i32>} : memref<1x8x32xf32, #tpu.memory_space<vmem>>, vector<1x8x32xf32>,
    return
  }
  func.func @transform_0(%arg0: i32) -> (i32, i32, i32) {
    %c0_i32 = arith.constant 0 : i32
    %c0_i32_0 = arith.constant 0 : i32
    %c0_i32_1 = arith.constant 0 : i32
    return %arg0, %c0_i32, %c0_i32_0 : i32, i32, i32
  }
  func.func @transform_1(%arg0: i32) -> (i32, i32, i32) {
    %c0_i32 = arith.constant 0 : i32
    %c0_i32_0 = arith.constant 0 : i32
    %c0_i32_1 = arith.constant 0 : i32
    return %arg0, %c0_i32, %c0_i32_0 : i32, i32, i32
  }
  func.func @transform_2(%arg0: i32) -> (i32, i32) {
    %c0_i32 = arith.constant 0 : i32
    %c0_i32_0 = arith.constant 0 : i32
    %c0_i32_1 = arith.constant 0 : i32
    return %c0_i32, %c0_i32_0 : i32, i32
  }
  func.func @transform_3(%arg0: i32) -> (i32, i32) {
    %c0_i32 = arith.constant 0 : i32
    %c0_i32_0 = arith.constant 0 : i32
    %c0_i32_1 = arith.constant 0 : i32
    return %c0_i32, %c0_i32_0 : i32, i32
  }
  func.func @transform_4(%arg0: i32) -> (i32, i32) {
    %c0_i32 = arith.constant 0 : i32
    %c0_i32_0 = arith.constant 0 : i32
    %c0_i32_1 = arith.constant 0 : i32
    return %c0_i32, %c0_i32_0 : i32, i32
  }
  func.func @transform_5(%arg0: i32) -> (i32, i32) {
    %c0_i32 = arith.constant 0 : i32
    %c0_i32_0 = arith.constant 0 : i32
    %c0_i32_1 = arith.constant 0 : i32
    return %c0_i32, %c0_i32_0 : i32, i32
  }
  func.func @transform_6(%arg0: i32) -> (i32, i32) {
    %c0_i32 = arith.constant 0 : i32
    %c0_i32_0 = arith.constant 0 : i32
    %c0_i32_1 = arith.constant 0 : i32
    return %c0_i32, %c0_i32_0 : i32, i32
  }
  func.func @transform_7(%arg0: i32) -> (i32, i32) {
    %c0_i32 = arith.constant 0 : i32
    %c0_i32_0 = arith.constant 0 : i32
    %c0_i32_1 = arith.constant 0 : i32
    return %c0_i32, %c0_i32_0 : i32, i32
  }
  func.func @transform_8(%arg0: i32) -> (i32, i32) {
    %c0_i32 = arith.constant 0 : i32
    %c0_i32_0 = arith.constant 0 : i32
    %c0_i32_1 = arith.constant 0 : i32
    return %c0_i32, %c0_i32_0 : i32, i32
  }
  func.func @transform_9(%arg0: i32) -> (i32, i32) {
    %c0_i32 = arith.constant 0 : i32
    %c0_i32_0 = arith.constant 0 : i32
    %c0_i32_1 = arith.constant 0 : i32
    return %c0_i32, %c0_i32_0 : i32, i32
  }
  func.func @transform_10(%arg0: i32) -> (i32, i32) {
    %c0_i32 = arith.constant 0 : i32
    %c0_i32_0 = arith.constant 0 : i32
    %c0_i32_1 = arith.constant 0 : i32
    return %c0_i32, %c0_i32_0 : i32, i32
  }
  func.func @transform_11(%arg0: i32) -> (i32, i32) {
    %c0_i32 = arith.constant 0 : i32
    %c0_i32_0 = arith.constant 0 : i32
    %c0_i32_1 = arith.constant 0 : i32
    return %c0_i32, %c0_i32_0 : i32, i32
  }
  func.func @transform_12(%arg0: i32) -> (i32, i32) {
    %c0_i32 = arith.constant 0 : i32
    %c0_i32_0 = arith.constant 0 : i32
    %c0_i32_1 = arith.constant 0 : i32
    return %c0_i32, %c0_i32_0 : i32, i32
  }
  func.func @transform_13(%arg0: i32) -> (i32, i32) {
    %c0_i32 = arith.constant 0 : i32
    %c0_i32_0 = arith.constant 0 : i32
    %c0_i32_1 = arith.constant 0 : i32
    return %c0_i32, %c0_i32_0 : i32, i32
  }
  func.func @transform_14(%arg0: i32) -> (i32, i32, i32) {
    %c0_i32 = arith.constant 0 : i32
    %c0_i32_0 = arith.constant 0 : i32
    %c0_i32_1 = arith.constant 0 : i32
    return %arg0, %c0_i32, %c0_i32_0 : i32, i32, i32
  }
}

</mosaic_0001>

<bundles_post_ra>
// kernel: tpu_custom_call.1
= control target key start
LH: loop header
LB: loop body
LE: loop exit
PB: predicated region body
PF: predicated region fallthrough
CT: control target
= control target key end

     0   :  { %s2812_s0 = inlined_call_operand.hbm [shape: f32[2,8,32], index: 0, kind: input, shape index: {}]   ;;  %s2813_s1 = inlined_call_operand.hbm [shape: f32[2,8,8], index: 1, kind: input, shape index: {}]   ;;  %s2814_s2 = inlined_call_operand.vmem [shape: f32[32,96], index: 2, kind: input, shape index: {}]   ;;  %s2815_s3 = inlined_call_operand.vmem [shape: f32[1,96], index: 3, kind: input, shape index: {}]   ;;  %s2816_s4 = inlined_call_operand.vmem [shape: f32[32,32], index: 4, kind: input, shape index: {}]   ;;  %s2817_s5 = inlined_call_operand.vmem [shape: f32[1,32], index: 5, kind: input, shape index: {}]   ;;  %s2818_s6 = inlined_call_operand.vmem [shape: f32[1,32], index: 6, kind: input, shape index: {}]   ;;  %s2819_s7 = inlined_call_operand.vmem [shape: f32[1,32], index: 7, kind: input, shape index: {}]   ;;  %s2820_s8 = inlined_call_operand.vmem [shape: f32[32,64], index: 8, kind: input, shape index: {}]   ;;  %s2821_s9 = inlined_call_operand.vmem [shape: f32[1,64], index: 9, kind: input, shape index: {}]   ;;  %s2822_s10 = inlined_call_operand.vmem [shape: f32[64,32], index: 10, kind: input, shape index: {}]   ;;  %s2823_s11 = inlined_call_operand.vmem [shape: f32[1,32], index: 11, kind: input, shape index: {}]   ;;  %s2824_s12 = inlined_call_operand.vmem [shape: f32[1,32], index: 12, kind: input, shape index: {}]   ;;  %s2825_s13 = inlined_call_operand.vmem [shape: f32[1,32], index: 13, kind: input, shape index: {}]   ;;  %s2826_s14 = inlined_call_operand.hbm [shape: f32[2,8,32], index: 14, kind: output, shape index: {}]  }
   0x1   :  { %2837 = sst [smem:[#allocation16_spill]] %s2812_s0 }
   0x2   :  { %2838 = sst [smem:[#allocation17_spill]] %s2825_s13 }
   0x3   :  { %2839 = sst [smem:[#allocation18_spill]] %s2826_s14 }
   0x4   :  { %19 = vsyncpa [#allocation3], 0 }
   0x5   :  { %21 = vsyncpa [#allocation3 + $0x1], 0 }
   0x6   :  { %22 = vsyncpa [#allocation6], 0 }
   0x7   :  { %24 = vsyncpa [#allocation6 + $0x1], 0 }
   0x8   :  { %25 = vsyncpa [#allocation4], 0 }
   0x9   :  { %27 = vsyncpa [#allocation4 + $0x1], 0  ;;  %s2411_s29 = smov 0   ;;  %s2413_s30 = smov 0  }
   0xa   :  { %s2415_s15 = smov 0   ;;  %s2417_s16 = smov 0  }
   0xb LB: > { %2840 = sst [smem:[#allocation11_spill]] %s2306_s29  ;;  %s2432_s17 = sadd.s32 4294967295, %s2318_s16   ;;  %s2318_s16 = sphi %s2417_s16, %s2865_s16   ;;  %s2314_s15 = sphi %s2415_s15, %s2867_s15   ;;  %s2310_s30 = sphi %s2413_s30, %s2869_s30   ;;  %s2306_s29 = sphi %s2411_s29, %s2868_s29  }
   0xc   : > { %2841 = sst [smem:[#allocation12_spill]] %s2314_s15  ;;  %s1924_s18 = sadd.s32 4294967294, %s2318_s16  }
   0xd   : > { %s2436_s19 = sadd.s32 1, %s2318_s16   ;;  %s40_s20 = sadd.s32 1, %s2314_s15 }
   0xe   : > { %2842 = sst [smem:[#allocation13_spill]] %s2436_s19  ;;  %s37_s21 = ssub.s32 %s2318_s16, %s2436_s19 }
   0xf   : > { %p47_p0 = scmp.ne.s32.totalorder %s2314_s15, %s2310_s30  ;;  %p38_p1 = scmp.eq.s32.totalorder %s37_s21, 0 }
  0x10   : > { %p48_p2 = scmp.eq.s32.totalorder %s2318_s16, 0  ;;  %p53_p3 = scmp.ne.s32.totalorder %s2310_s30, %s2306_s29 }
  0x11   : > { %p54_p4 = scmp.eq.s32.totalorder %s2432_s17, 0  ;;  %p355_p7 = scmp.eq.s32.totalorder %s2432_s17, 1 }
  0x12   : > { %s2448_s22 = scalar_select %p38_p1, %s2314_s15, %s40_s20  }
  0x13   : > { %p2450_p5 = por %p48_p2, %p47_p0  ;;  %p2454_p6 = por %p54_p4, %p53_p3 }
  0x14   : > { %2843 = sst [smem:[#allocation14_spill]] %s2448_s22  ;;  %p361_p8 = scmp.eq.s32.totalorder %s1924_s18, 1 }
  0x15   : > { %s2845_s24 = scalar_select %p2454_p6, 1, 0 }
  0x16   : > { %p2127_p10 = scmp.lt.s32.totalorder %s2318_s16, 2  ;;  %p2461_p11 = por %p355_p7, %p47_p0 }
  0x17   : > { %p2465_p12 = por %p361_p8, %p53_p3  ;;  %s2470_s27 = sand.u32 1, %s2314_s15  }
  0x18   : > { %s2846_s25 = scalar_select %p2461_p11, 1, 0 }
  0x19   : > { %s2847_s26 = scalar_select %p2465_p12, 1, 0 }
  0x1a   : > { %s2832_s28 = sshll.u32 %s2318_s16, 7  ;;  %s2831_s20 = sshll.u32 %s2470_s27, 3 }
  0x1b   : > { %2848 = sst [smem:[#allocation15_spill]] %s2847_s26  ;;  %s421_s19 = scalar_lea.vmem [#allocation2], %s2831_s20 }
  0x1c   : > { %s2849_s0 = sld [smem:[#allocation16_spill]]  ;;  %s428_s29 = sshll.u32 %s421_s19, 4  ;;  %s2489_s29 = int_to_ptr.vmem [resolvable:$true] %s428_s29 }
  0x1d   : > { %p2485_p13 = pnand %p2127_p10, %p2450_p5  ;;  %s418_s21 = scalar_lea.sflag [#allocation3], %s2470_s27 }
  0x1f   : > { %p2196_p3 = pneg %p2485_p13 }
  0x22   : > { %s2479_s22 = scalar_lea.hbm %s2849_s0, %s2832_s28  ;;  %s2199_s20 = scalar_lea.hbm %s2849_s0, 256 }
  0x23   : > { %s2194_s18 = scalar_lea.hbm %s2479_s22, 128  ;;  %p2200_p5 = scmp.lt.s32.totalorder %s2479_s22, %s2849_s0 }
  0x24   : > { %p2195_p2 = scmp.ne.s32.totalorder %s2479_s22, %s2194_s18  ;;  %p2201_p8 = scmp.lt.s32.totalorder %s2199_s20, %s2194_s18 }
  0x26   : > { %p2197_p4 = pnand %p2196_p3, %p2195_p2  ;;  %p2202_p10 = por %p2201_p8, %p2200_p5 }
  0x28   : > { %p2198_p7 = pneg %p2197_p4 }
  0x2a   : > { %p2203_p9 = pnand %p2202_p10, %p2198_p7 }
  0x2c   : > { %2206 = shalt.err (!%p2203_p9)
}
  0x2d   : > { %s2207_s14 = scalar_lea.vmem %s2489_s29, 128  ;;  %s2320_s19 = smov [#allocation2]  }
  0x2e   : > { %p2208_p0 = scmp.ne.s32.totalorder %s2489_s29, %s2207_s14  ;;  %s2212_s23 = sshll.u32 %s2320_s19, 4  ;;  %s2213_s23 = int_to_ptr.vmem [resolvable:$false] %s2212_s23 }
  0x2f   : > { %s2214_s13 = scalar_lea.vmem %s2213_s23, 256  ;;  %p2215_p1 = scmp.lt.s32.totalorder %s2489_s29, %s2213_s23 }
  0x30   : > { %p2210_p2 = pnand %p2208_p0, %p2196_p3  ;;  %p2216_p12 = scmp.lt.s32.totalorder %s2214_s13, %s2207_s14 }
  0x32   : > { %p2211_p4 = pneg %p2210_p2  ;;  %p2217_p11 = por %p2216_p12, %p2215_p1 }
  0x34   : > { %p2218_p5 = pnand %p2217_p11, %p2211_p4 }
  0x36   : > { %2221 = shalt.err (!%p2218_p5)
}
  0x37   : > { %2119 = dma.hbm_to_vmem [thread:$0]  (!%p2485_p13), %s2479_s22, 128, %s2489_s29, %s418_s21  }
  0x38   : > { %p2851_p9 = scmp.lt.s32.totalorder %s2318_s16, 3  ;;  %p2852_p0 = scmp.ge.s32.totalorder %s2318_s16, 1 }
  0x39   : > { %s2854_s13 = sshll.u32 %s2318_s16, 7  ;;  %s2855_s18 = sshll.u32 %s2470_s27, 3 }
  0x3a   : > { %p2522_p7 = pnand %p2852_p0, %p2851_p9  ;;  %s2531_s20 = scalar_lea.hbm %s2813_s1, %s2854_s13 }
  0x3b   : > { %s439_s19 = scalar_lea.vmem [#allocation5], %s2855_s18  ;;  %s436_s29 = scalar_lea.sflag [#allocation6], %s2470_s27 }
  0x3c   : > { %s2853_s26 = scalar_select %p2522_p7, 1, 0 }
  0x3d   : > { %s446_s23 = sshll.u32 %s439_s19, 4  ;;  %s2222_s22 = scalar_lea.hbm %s2531_s20, 128  ;;  %s447_s23 = int_to_ptr.vmem [resolvable:$true] %s446_s23 }
  0x3e   : > { %p2223_p11 = scmp.ne.s32.totalorder %s2531_s20, %s2222_s22  ;;  %s2227_s14 = scalar_lea.hbm %s2813_s1, 256 }
  0x3f   : > { %p2228_p8 = scmp.lt.s32.totalorder %s2531_s20, %s2813_s1  ;;  %p2229_p10 = scmp.lt.s32.totalorder %s2227_s14, %s2222_s22 }
  0x40   : > { %p2225_p12 = pnand %p2223_p11, %p2196_p3 }
  0x41   : > { %p2230_p2 = por %p2229_p10, %p2228_p8 }
  0x42   : > { %p2226_p1 = pneg %p2225_p12 }
  0x44   : > { %p2231_p4 = pnand %p2230_p2, %p2226_p1 }
  0x46   : > { %2234 = shalt.err (!%p2231_p4)
}
  0x47   : > { %s2235_s18 = scalar_lea.vmem %s447_s23, 128  ;;  %s2321_s27 = smov [#allocation5]  }
  0x48   : > { %p2236_p5 = scmp.ne.s32.totalorder %s447_s23, %s2235_s18  ;;  %s2240_s19 = sshll.u32 %s2321_s27, 4  ;;  %s2241_s19 = int_to_ptr.vmem [resolvable:$false] %s2240_s19 }
  0x49   : > { %s2242_s0 = scalar_lea.vmem %s2241_s19, 256  ;;  %p2243_p11 = scmp.lt.s32.totalorder %s447_s23, %s2241_s19 }
  0x4a   : > { %p2238_p9 = pnand %p2236_p5, %p2196_p3  ;;  %p2244_p12 = scmp.lt.s32.totalorder %s2242_s0, %s2235_s18 }
  0x4c   : > { %p2239_p0 = pneg %p2238_p9  ;;  %p2245_p6 = por %p2244_p12, %p2243_p11 }
  0x4e   : > { %p2246_p7 = pnand %p2245_p6, %p2239_p0 }
  0x50   : > { %2249 = shalt.err (!%p2246_p7)
}
  0x51   : > { %2122 = dma.hbm_to_vmem [thread:$0]  (!%p2485_p13), %s2531_s20, 128, %s447_s23, %s436_s29  }
  0x52   : > { %p2856_p1 = scmp.ne.s32.totalorder %s2853_s26, 0 }
  0x53   : > { %s2557_s22 = sand.u32 (!%p2856_p1), 1, %s2310_s30   ;;  %p2857_p6 = scmp.ne.s32.totalorder (!%p2856_p1), %s2845_s24, 0 }
  0x54   : > { %455 = sbr.rel (%p2856_p1) target bundleno = 3562 (0xdea), region = 76  ;;  %s2560_s21 = sshll.u32 (!%p2856_p1), %s2557_s22, 3 }
  0x55   : > { %s458_s14 = scalar_lea.sflag (!%p2856_p1), [#allocation3], %s2557_s22  ;;  %s461_s13 = scalar_lea.vmem (!%p2856_p1), [#allocation2], %s2560_s21 }
  0x59   : > { %2293 = dma.done.wait (%p2857_p6), %s458_s14, 128  }
  0x5a   : > { %2295 = vsyncadd (%p2857_p6), %s458_s14, 4294967168  ;;  %s467_s15 = scalar_lea.sflag [#allocation6], %s2557_s22  ;;  %s470_s26 = scalar_lea.vmem [#allocation5], %s2560_s21 }
  0x5b   : > { %2297 = dma.done.wait (%p2857_p6), %s467_s15, 128  }
  0x5c   : > { %2299 = vsyncadd (%p2857_p6), %s467_s15, 4294967168  ;;  %v2322_v0 = vmov 0.0   ;;  %vm2323_vm0 = vmmov 0   ;;  %v525_v1 = vld [vmem:[%s2814_s2 + $0x18] sm:$0xff]  ;;  %v524_v2 = vld [vmem:[%s2814_s2 + $0x10] sm:$0xff]  ;;  %vm533_vm1 = vcmask 261120  }
  0x5d   : > { %2009 = vmatprep.subr.mxu0 %v2322_v0  ;;  %2017 = vmatprep.mubr.msk.f32.mxu0 %vm2323_vm0, %v2322_v0  ;;  %v523_v3 = vld [vmem:[%s2814_s2 + $0x8] sm:$0xff]  ;;  %v522_v4 = vld [vmem:[%s2814_s2] sm:$0xff]  ;;  %s2325_s15 = smov 96   ;;  %s2326_s20 = smov 88   ;;  %vm615_vm2 = vcmask 64512   ;;  %v2623_v14 = vld [vmem:[%s470_s26] sm:$0xff] }
  0x5e   : > { %2025 = vmatprep.subr.mxu1 %v2322_v0  ;;  %2027 = vmatprep.mubr.msk.f32.mxu1 %vm2323_vm0, %v2322_v0  ;;  %v2594_v5 = vld [vmem:[%s461_s13] sm:$0xff]  ;;  %s2324_s13 = smov 120   ;;  %s2327_s26 = smov 56   ;;  %vm1712_vm3 = vcmask 523264  }
  0x5f   : > { %2010 = vmatpush3.msra.mxu0 %v525_v1  ;;  %v1935_v6 = vld [vmem:[%s2815_s3] ss:$0 sm:$0xff]  ;;  %s2328_s23 = smov 64   ;;  %s2329_s29 = smov 80   ;;  %v608_v43 = vld [vmem:[%s2816_s4 + $0x8] sm:$0xff] }
  0x60   : > { %2011 = vmatprep.subr.mxu0 %v2322_v0  ;;  %s2330_s28 = smov 112   ;;  %v607_v42 = vld [vmem:[%s2816_s4] sm:$0xff]  ;;  %s2331_s0 = smov 72  }
  0x61   : > { %2012 = vmatpush3.msra.mxu0 %v524_v2  ;;  %s2332_s14 = smov 104   ;;  %s519_s24 = scalar_lea.vmem [#allocation7], %s2560_s21 }
  0x62   : > { %2013 = vmatprep.subr.mxu0 %v2322_v0  ;;  %s1831_s18 = sshll.u32 %s519_s24, 4  ;;  %p2860_p3 = scmp.ne.s32.totalorder %s2846_s25, 0  ;;  %s1832_s18 = int_to_ptr.vmem [resolvable:$true] %s1831_s18 }
  0x63   : > { %2014 = vmatpush3.msra.mxu0 %v523_v3 }
  0x64   : > { %2015 = vmatprep.subr.mxu0 %v2322_v0 }
  0x65   : > { %2016 = vmatpush3.msra.mxu0 %v522_v4 }
  0x66   : > { %2018 = vmatmul.mubr.msk.f32.vlgmr.msra.gmra.mxu0 %vm533_vm1, %v2594_v5  ;;  %2020 = vmatprep.subr.mxu0 %v2322_v0 }
  0x67   : > { %2022 = vmatprep.mubr.msk.f32.mxu0 %vm2323_vm0, %v2322_v0 }
 0x126   : > { %v603_v7 = vpop.f32.mrf.mxu0 }
 0x127   : > { %v2605_v8 = vadd.f32 %v1935_v6, %v603_v7 }
 0x128   : > { %v2019_v9 = vpop.f32.mrf.mxu0 }
 0x129   : > { %779 = vrot.lane.b32.xlu1 %v2605_v8, %s2324_s13  ;;  %613 = vrot.lane.b32.xlu0 %v2605_v8, %s2325_s15  ;;  %s2333_s13 = smov 48   ;;  %s2250_s15 = scalar_lea.vmem %s1832_s18, 128 }
 0x12a   : > { %p2251_p13 = scmp.ne.s32.totalorder %s1832_s18, %s2250_s15 }
 0x12c   : > { %p2252_p7 = pnand %p2251_p13, %p2860_p3 }
 0x12d   : > { %781 = vrot.lane.b32.xlu0 %v2605_v8, %s2326_s20  ;;  %s2335_s20 = smov [#allocation7]  }
 0x12e   : > { %p2253_p8 = pneg %p2252_p7 }
 0x19b   : > { %v614_v10 = vpop.permute.xlu0 %613  ;;  %v780_v12 = vpop.permute.xlu1 %779 }
 0x19c   : > { %2021 = vmatpush3.xpose.msk.msra.mxu0 %vm615_vm2, %v614_v10  ;;  %v609_v10 = vld [vmem:[%s2816_s4 + $0x10] sm:$0xff] }
 0x19d   : > { %2030 = vmatprep.subr.mxu0 %v2322_v0 }
 0x19f   : > { %2023 = vmatmul.mubr.msk.f32.vlgmr.msra.gmra.mxu0 %vm615_vm2, %v2605_v8  ;;  %v782_v11 = vpop.permute.xlu0 %781 }
 0x1a0   : > { %2031 = vmatpush3.xpose.msk.msra.mxu0 %vm615_vm2, %v782_v11  ;;  %2032 = vmatprep.mubr.msk.f32.mxu0 %vm2323_vm0, %v2322_v0 }
 0x1a1   : > { %2040 = vmatprep.subr.mxu0 %v2322_v0 }
 0x1a3   : > { %2033 = vmatmul.mubr.msk.f32.vlgmr.msra.gmra.mxu0 %vm615_vm2, %v780_v12 }
 0x1a4   : > { %2042 = vmatprep.mubr.msk.f32.mxu0 %vm2323_vm0, %v2322_v0  ;;  %2041 = vmatpush3.msra.mxu0 %v608_v43 }
 0x1a5   : > { %2050 = vmatprep.subr.mxu0 %v2322_v0 }
 0x25f   : > { %v686_v13 = vpop.f32.mrf.mxu0 }
 0x260   : > { %v690_v15 = vmul.f32 0.35355338, %v686_v13 }
 0x261   : > { %v2024_v16 = vpop.f32.mrf.mxu0 }
 0x262   : > { %v691_v17 = vadd.f32 %v690_v15, %v2623_v14 }
 0x263   : > { %v853_v18 = vpop.f32.mrf.mxu0 }
 0x264   : > { %v857_v19 = vmul.f32 0.35355338, %v853_v18  ;;  %v692_v20 = vsel %vm615_vm2, %v691_v17, -inf }
 0x265   : > { %693 = vmax.xlane.f32.xlu1 %v692_v20  ;;  %v2034_v21 = vpop.f32.mrf.mxu0 }
 0x266   : > { %v858_v22 = vadd.f32 %v857_v19, %v2623_v14 }
 0x268   : > { %v859_v23 = vsel %vm615_vm2, %v858_v22, -inf }
 0x269   : > { %860 = vmax.xlane.f32.xlu0 %v859_v23 }
 0x2ee   : > { %v694_v24 = vpop.xlane.xlu1 %693 }
 0x2ef   : > { %v695_v25 = vsub.f32 %v691_v17, %v694_v24 }
 0x2f1   : > { %v696_v26 = vmul.f32 1.442695, %v695_v25 }
 0x2f2   : > { %v861_v27 = vpop.xlane.xlu0 %860 }
 0x2f3   : > { %2174 = vpow2.f32 %v696_v26  ;;  %v862_v28 = vsub.f32 %v858_v22, %v861_v27 }
 0x2f5   : > { %v863_v29 = vmul.f32 1.442695, %v862_v28 }
 0x2f7   : > { %2176 = vpow2.f32 %v863_v29 }
 0x300   : > { %v2175_v30 = vpop.eup %2174 }
 0x301   : > { %v698_v31 = vsel %vm615_vm2, %v2175_v30, 0.0 }
 0x302   : > { %699 = vadd.xlane.f32.xlu0 %v698_v31 }
 0x304   : > { %v2177_v32 = vpop.eup %2176 }
 0x305   : > { %v865_v33 = vsel %vm615_vm2, %v2177_v32, 0.0 }
 0x306   : > { %866 = vadd.xlane.f32.xlu1 %v865_v33 }
 0x317   : > { %870 = vrot.lane.b32.xlu1 %v2605_v8, %s2327_s26  ;;  %s2334_s26 = smov 40  }
 0x318   : > { %703 = vrot.lane.b32.xlu0 %v2605_v8, %s2328_s23 }
 0x31b   : > { %1094 = vrot.lane.b32.xlu1 %v2605_v8, %s2329_s29  ;;  %s2858_s29 = sld [smem:[#allocation17_spill]] }
 0x31c   : > { %1092 = vrot.lane.b32.xlu0 %v2605_v8, %s2330_s28  ;;  %s1963_s28 = sshll.u32 %s2432_s17, 7 }
 0x38b   : > { %v700_v34 = vpop.xlane.xlu0 %699 }
 0x38c   : > { %2178 = vrcp.f32 %v700_v34 }
 0x38f   : > { %v867_v35 = vpop.xlane.xlu1 %866  ;;  %v704_v36 = vpop.permute.xlu0 %703 }
 0x390   : > { %2180 = vrcp.f32 %v867_v35  ;;  %2026 = vmatpush3.msra.mxu1 %v704_v36 }
 0x391   : > { %2035 = vmatprep.subr.mxu1 %v2322_v0 }
 0x393   : > { %v871_v39 = vpop.permute.xlu1 %870  ;;  %v1093_v49 = vpop.permute.xlu0 %1092 }
 0x397   : > { %v1095_v47 = vpop.permute.xlu1 %1094 }
 0x399   : > { %v2179_v37 = vpop.eup %2178 }
 0x39a   : > { %v702_v38 = vmul.f32 %v2179_v37, %v2175_v30 }
 0x39c   : > { %2028 = vmatmul.mubr.msk.f32.vlgmr.msra.gmra.mxu1 %vm615_vm2, %v702_v38 }
 0x39d   : > { %v2181_v40 = vpop.eup %2180  ;;  %2036 = vmatpush3.msra.mxu1 %v871_v39  ;;  %2037 = vmatprep.mubr.msk.f32.mxu1 %vm2323_vm0, %v2322_v0 }
 0x39e   : > { %v869_v41 = vmul.f32 %v2181_v40, %v2177_v32  ;;  %2045 = vmatprep.subr.mxu1 %v2322_v0  ;;  %v1953_v32 = vld [vmem:[%s2817_s5] ss:$0 sm:$0xff] }
 0x3a0   : > { %2038 = vmatmul.mubr.msk.f32.vlgmr.msra.gmra.mxu1 %vm615_vm2, %v869_v41 }
 0x3a1   : > { %2047 = vmatprep.mubr.msk.f32.mxu1 %vm2323_vm0, %v2322_v0  ;;  %2046 = vmatpush3.msra.mxu1 %v607_v42 }
 0x3a2   : > { %2055 = vmatprep.subr.mxu1 %v2322_v0 }
 0x45c   : > { %v775_v44 = vpop.f32.mrf.mxu1 }
 0x45d   : > { %2048 = vmatmul.mubr.msk.f32.vlgmr.msra.gmra.mxu1 %vm615_vm2, %v775_v44  ;;  %v1615_v44 = vld [vmem:[%s2820_s8 + $0x18] sm:$0xff] }
 0x45e   : > { %v2029_v45 = vpop.f32.mrf.mxu1  ;;  %2057 = vmatprep.mubr.msk.f32.mxu1 %vm2323_vm0, %v2322_v0 }
 0x45f   : > { %v1614_v45 = vld [vmem:[%s2820_s8 + $0x10] sm:$0xff] }
 0x460   : > { %v942_v46 = vpop.f32.mrf.mxu1 }
 0x461   : > { %2043 = vmatmul.mubr.msk.f32.vlgmr.msra.gmra.mxu0 %vm615_vm2, %v942_v46  ;;  %v1612_v46 = vld [vmem:[%s2820_s8] sm:$0xff] }
 0x462   : > { %2051 = vmatpush3.xpose.msk.msra.mxu0 %vm615_vm2, %v1095_v47  ;;  %v2039_v48 = vpop.f32.mrf.mxu1  ;;  %2052 = vmatprep.mubr.msk.f32.mxu0 %vm2323_vm0, %v2322_v0  ;;  %v1624_v47 = vld [vmem:[%s2822_s10 + $0x38] sm:$0xff] }
 0x463   : > { %2060 = vmatprep.subr.mxu0 %v2322_v0  ;;  %v1623_v48 = vld [vmem:[%s2822_s10 + $0x30] sm:$0xff] }
 0x465   : > { %2053 = vmatmul.mubr.msk.f32.vlgmr.msra.gmra.mxu0 %vm615_vm2, %v1093_v49  ;;  %v1622_v49 = vld [vmem:[%s2822_s10 + $0x28] sm:$0xff] }
 0x466   : > { %2062 = vmatprep.mubr.msk.f32.mxu0 %vm2323_vm0, %v2322_v0  ;;  %2061 = vmatpush3.msra.mxu0 %v609_v10 }
 0x467   : > { %2070 = vmatprep.subr.mxu0 %v2322_v0 }
 0x51d   : > { %v1088_v50 = vpop.f32.mrf.mxu1 }
 0x51f   : > { %v2049_v51 = vpop.f32.mrf.mxu1 }
 0x520   : > { %v1620_v51 = vld [vmem:[%s2822_s10 + $0x18] sm:$0xff] }
 0x521   : > { %v1015_v52 = vpop.f32.mrf.mxu0 }
 0x522   : > { %v2662_v53 = vadd.f32 %v1088_v50, %v1015_v52  ;;  %v1621_v50 = vld [vmem:[%s2822_s10 + $0x20] sm:$0xff] }
 0x523   : > { %v2044_v54 = vpop.f32.mrf.mxu0 }
 0x525   : > { %v1166_v55 = vpop.f32.mrf.mxu0 }
 0x526   : > { %v1170_v56 = vmul.f32 0.35355338, %v1166_v55 }
 0x527   : > { %v2054_v57 = vpop.f32.mrf.mxu0 }
 0x528   : > { %v1171_v58 = vadd.f32 %v1170_v56, %v2623_v14  ;;  %v1954_v56 = vld [vmem:[%s2818_s6] ss:$0 sm:$0xff] }
 0x52a   : > { %v1172_v59 = vsel %vm615_vm2, %v1171_v58, -inf }
 0x52b   : > { %1173 = vmax.xlane.f32.xlu1 %v1172_v59 }
 0x53c   : > { %1335 = vrot.lane.b32.xlu1 %v2605_v8, %s2331_s0  ;;  %s2859_s0 = sld [smem:[#allocation18_spill]] }
 0x540   : > { %1333 = vrot.lane.b32.xlu1 %v2605_v8, %s2332_s14 }
 0x542   : > { %s1829_s14 = scalar_lea.hbm %s2859_s0, %s1963_s28 }
 0x5b4   : > { %v1174_v60 = vpop.xlane.xlu1 %1173 }
 0x5b5   : > { %v1175_v61 = vsub.f32 %v1171_v58, %v1174_v60  ;;  %v1955_v58 = vld [vmem:[%s2819_s7] ss:$0 sm:$0xff] }
 0x5b7   : > { %v1176_v62 = vmul.f32 1.442695, %v1175_v61  ;;  %v1619_v61 = vld [vmem:[%s2822_s10 + $0x10] sm:$0xff] }
 0x5b8   : > { %v1336_v6 = vpop.permute.xlu1 %1335 }
 0x5b9   : > { %2182 = vpow2.f32 %v1176_v62  ;;  %v1618_v62 = vld [vmem:[%s2822_s10 + $0x8] sm:$0xff] }
 0x5bc   : > { %v1334_v9 = vpop.permute.xlu1 %1333 }
 0x5c6   : > { %v2183_v63 = vpop.eup %2182 }
 0x5c7   : > { %v1178_v1 = vsel %vm615_vm2, %v2183_v63, 0.0 }
 0x5c8   : > { %1179 = vadd.xlane.f32.xlu0 %v1178_v1  ;;  %v1956_v1 = vld [vmem:[%s2821_s9] ss:$0 sm:$0xff] }
 0x5de   : > { %1183 = vrot.lane.b32.xlu0 %v2605_v8, %s2333_s13  ;;  %s1818_s13 = scalar_lea.sflag [#allocation4], %s2557_s22 }
 0x651   : > { %v1180_v2 = vpop.xlane.xlu0 %1179 }
 0x652   : > { %2184 = vrcp.f32 %v1180_v2 }
 0x655   : > { %v1184_v3 = vpop.permute.xlu0 %1183 }
 0x656   : > { %2056 = vmatpush3.msra.mxu1 %v1184_v3 }
 0x657   : > { %2065 = vmatprep.subr.mxu1 %v2322_v0 }
 0x65f   : > { %v2185_v4 = vpop.eup %2184 }
 0x660   : > { %v1182_v7 = vmul.f32 %v2185_v4, %v2183_v63  ;;  %v1617_v63 = vld [vmem:[%s2822_s10] sm:$0xff] }
 0x662   : > { %2058 = vmatmul.mubr.msk.f32.vlgmr.msra.gmra.mxu1 %vm615_vm2, %v1182_v7  ;;  %v1958_v7 = vld [vmem:[%s2823_s11] ss:$0 sm:$0xff] }
 0x663   : > { %2066 = vmatpush3.xpose.msk.msra.mxu1 %vm615_vm2, %v1336_v6  ;;  %2067 = vmatprep.mubr.msk.f32.mxu1 %vm2323_vm0, %v2322_v0 }
 0x664   : > { %2075 = vmatprep.subr.mxu1 %v2322_v0 }
 0x666   : > { %2068 = vmatmul.mubr.msk.f32.vlgmr.msra.gmra.mxu1 %vm615_vm2, %v1334_v9 }
 0x667   : > { %2077 = vmatprep.mubr.msk.f32.mxu1 %vm2323_vm0, %v2322_v0 }
 0x722   : > { %v1255_v11 = vpop.f32.mrf.mxu1 }
 0x723   : > { %2063 = vmatmul.mubr.msk.f32.vlgmr.msra.gmra.mxu0 %vm615_vm2, %v1255_v11 }
 0x724   : > { %v2059_v12 = vpop.f32.mrf.mxu1  ;;  %2072 = vmatprep.mubr.msk.f32.mxu0 %vm2323_vm0, %v2322_v0 }
 0x726   : > { %v1407_v13 = vpop.f32.mrf.mxu1 }
 0x727   : > { %v1411_v15 = vmul.f32 0.35355338, %v1407_v13 }
 0x728   : > { %v2069_v16 = vpop.f32.mrf.mxu1 }
 0x729   : > { %v1412_v17 = vadd.f32 %v1411_v15, %v2623_v14  ;;  %v610_v14 = vld [vmem:[%s2816_s4 + $0x18] sm:$0xff] }
 0x72a   : > { %2076 = vmatpush3.msra.mxu1 %v610_v14 }
 0x72b   : > { %v1413_v18 = vsel %vm615_vm2, %v1412_v17, -inf  ;;  %2091 = vmatprep.subr.mxu1 %v2322_v0 }
 0x72c   : > { %1414 = vmax.xlane.f32.xlu0 %v1413_v18 }
 0x742   : > { %1424 = vrot.lane.b32.xlu0 %v2605_v8, %s2334_s26  ;;  %s2254_s26 = sshll.u32 %s2335_s20, 4  ;;  %s2255_s26 = int_to_ptr.vmem [resolvable:$false] %s2254_s26 }
 0x743   : > { %s2256_s17 = scalar_lea.vmem %s2255_s26, 256  ;;  %p2257_p10 = scmp.lt.s32.totalorder %s1832_s18, %s2255_s26 }
 0x744   : > { %p2258_p2 = scmp.lt.s32.totalorder %s2256_s17, %s2250_s15 }
 0x746   : > { %p2259_p4 = por %p2258_p2, %p2257_p10 }
 0x748   : > { %p2260_p5 = pnand %p2259_p4, %p2253_p8 }
 0x7b5   : > { %v1415_v19 = vpop.xlane.xlu0 %1414 }
 0x7b6   : > { %v1416_v20 = vsub.f32 %v1412_v17, %v1415_v19 }
 0x7b8   : > { %v1417_v21 = vmul.f32 1.442695, %v1416_v20 }
 0x7b9   : > { %v1425_v22 = vpop.permute.xlu0 %1424 }
 0x7ba   : > { %2186 = vpow2.f32 %v1417_v21  ;;  %2071 = vmatpush3.msra.mxu0 %v1425_v22 }
 0x7bb   : > { %2080 = vmatprep.subr.mxu0 %v2322_v0 }
 0x7c7   : > { %v2187_v23 = vpop.eup %2186 }
 0x7c8   : > { %v1419_v24 = vsel %vm615_vm2, %v2187_v23, 0.0 }
 0x7c9   : > { %1420 = vadd.xlane.f32.xlu1 %v1419_v24 }
 0x7e3   : > { %v1328_v25 = vpop.f32.mrf.mxu0 }
 0x7e4   : > { %v1332_v26 = vadd.f32 %v1328_v25, %v2662_v53  ;;  %v1961_v25 = vld [vmem:[%s2858_s29] ss:$0 sm:$0xff] }
 0x7e5   : > { %v2064_v8 = vpop.f32.mrf.mxu0 }
 0x852   : > { %v1421_v27 = vpop.xlane.xlu1 %1420 }
 0x853   : > { %2188 = vrcp.f32 %v1421_v27 }
 0x860   : > { %v2189_v28 = vpop.eup %2188 }
 0x861   : > { %v1423_v29 = vmul.f32 %v2189_v28, %v2187_v23  ;;  %v1960_v23 = vld [vmem:[%s2824_s12] ss:$0 sm:$0xff] }
 0x863   : > { %2073 = vmatmul.mubr.msk.f32.vlgmr.msra.gmra.mxu0 %vm615_vm2, %v1423_v29 }
 0x864   : > { %2088 = vmatprep.mubr.msk.f32.mxu0 %vm2323_vm0, %v2322_v0  ;;  %2081 = vmatpush3.msra.mxu0 %v1615_v44 }
 0x865   : > { %2082 = vmatprep.subr.mxu0 %v2322_v0 }
 0x866   : > { %2083 = vmatpush3.msra.mxu0 %v1614_v45 }
 0x867   : > { %2084 = vmatprep.subr.mxu0 %v2322_v0 }
 0x923   : > { %v1496_v30 = vpop.f32.mrf.mxu0 }
 0x924   : > { %2078 = vmatmul.mubr.msk.f32.vlgmr.msra.gmra.mxu1 %vm615_vm2, %v1496_v30 }
 0x925   : > { %v2074_v31 = vpop.f32.mrf.mxu0  ;;  %2107 = vmatprep.mubr.msk.f32.mxu1 %vm2323_vm0, %v2322_v0  ;;  %2092 = vmatpush3.msra.mxu1 %v1624_v47 }
 0x926   : > { %2093 = vmatprep.subr.mxu1 %v2322_v0 }
 0x927   : > { %2094 = vmatpush3.msra.mxu1 %v1623_v48 }
 0x928   : > { %2095 = vmatprep.subr.mxu1 %v2322_v0 }
 0x929   : > { %2096 = vmatpush3.msra.mxu1 %v1622_v49 }
 0x92a   : > { %2097 = vmatprep.subr.mxu1 %v2322_v0 }
 0x92b   : > { %2098 = vmatpush3.msra.mxu1 %v1621_v50 }
 0x92c   : > { %2099 = vmatprep.subr.mxu1 %v2322_v0 }
 0x92d   : > { %2100 = vmatpush3.msra.mxu1 %v1620_v51 }
 0x92e   : > { %2101 = vmatprep.subr.mxu1 %v2322_v0 }
 0x92f   : > { %2102 = vmatpush3.msra.mxu1 %v1619_v61 }
 0x930   : > { %2103 = vmatprep.subr.mxu1 %v2322_v0 }
 0x931   : > { %2104 = vmatpush3.msra.mxu1 %v1618_v62 }
 0x932   : > { %2105 = vmatprep.subr.mxu1 %v2322_v0 }
 0x933   : > { %2106 = vmatpush3.msra.mxu1 %v1617_v63 }
 0x9e4   : > { %v1569_v33 = vpop.f32.mrf.mxu1 }
 0x9e5   : > { %v1573_v34 = vadd.f32 %v1569_v33, %v1332_v26 }
 0x9e6   : > { %v2079_v35 = vpop.f32.mrf.mxu1 }
 0x9e7   : > { %v1580_v36 = vadd.f32 %v1953_v32, %v1573_v34 }
 0x9e9   : > { %v1583_v37 = vadd.f32 %v1580_v36, %v2594_v5  ;;  %v1613_v5 = vld [vmem:[%s2820_s8 + $0x8] sm:$0xff] }
 0x9ea   : > { %2085 = vmatpush3.msra.mxu0 %v1613_v5 }
 0x9eb   : > { %v1584_v38 = vsel %vm533_vm1, %v1583_v37, 0.0  ;;  %2086 = vmatprep.subr.mxu0 %v2322_v0 }
 0x9ec   : > { %1585 = vadd.xlane.f32.xlu1 %v1584_v38  ;;  %2087 = vmatpush3.msra.mxu0 %v1612_v46 }
 0xa75   : > { %v1586_v39 = vpop.xlane.xlu1 %1585 }
 0xa76   : > { %v1588_v40 = vmul.f32 0.03125, %v1586_v39 }
 0xa78   : > { %v1589_v41 = vsub.f32 %v1583_v37, %v1588_v40 }
 0xa7a   : > { %v1590_v42 = vmul.f32 %v1589_v41, %v1589_v41 }
 0xa7c   : > { %v1591_v43 = vsel %vm533_vm1, %v1590_v42, 0.0 }
 0xa7d   : > { %1592 = vadd.xlane.f32.xlu1 %v1591_v43 }
 0xb06   : > { %v1593_v52 = vpop.xlane.xlu1 %1592 }
 0xb07   : > { %v1594_v53 = vmul.f32 0.03125, %v1593_v52 }
 0xb09   : > { %v1595_v54 = vadd.f32 1e-12, %v1594_v53 }
 0xb0b   : > { %2190 = vrsqrt.f32 %v1595_v54 }
 0xb18   : > { %v2191_v55 = vpop.eup %2190 }
 0xb19   : > { %v1597_v57 = vmul.f32 %v2191_v55, %v1589_v41 }
 0xb1b   : > { %v1604_v59 = vmul.f32 %v1954_v56, %v1597_v57 }
 0xb1d   : > { %v1611_v60 = vadd.f32 %v1955_v58, %v1604_v59 }
 0xb1f   : > { %2089 = vmatmul.mubr.msk.f32.vlgmr.msra.gmra.mxu0 %vm533_vm1, %v1611_v60 }
 0xbdf   : > { %v1701_v2 = vpop.f32.mrf.mxu0 }
 0xbe0   : > { %v1702_v3 = vadd.f32 %v1956_v1, %v1701_v2 }
 0xbe1   : > { %v2090_v4 = vpop.f32.mrf.mxu0 }
 0xbe2   : > { %v1705_v6 = vmax.f32 %v1702_v3, 0.0 }
 0xbe4   : > { %2108 = vmatmul.mubr.msk.f32.vlgmr.msra.gmra.mxu1 %vm1712_vm3, %v1705_v6 }
 0xca4   : > { %v1782_v9 = vpop.f32.mrf.mxu1 }
 0xca5   : > { %v1783_v10 = vadd.f32 %v1958_v7, %v1782_v9 }
 0xca6   : > { %v2109_v11 = vpop.f32.mrf.mxu1 }
 0xca7   : > { %v1788_v12 = vadd.f32 %v1783_v10, %v1611_v60 }
 0xca9   : > { %v1789_v0 = vsel %vm533_vm1, %v1788_v12, 0.0 }
 0xcaa   : > { %1790 = vadd.xlane.f32.xlu1 %v1789_v0 }
 0xd33   : > { %v1791_v13 = vpop.xlane.xlu1 %1790 }
 0xd34   : > { %v1792_v15 = vmul.f32 0.03125, %v1791_v13 }
 0xd36   : > { %v1793_v16 = vsub.f32 %v1788_v12, %v1792_v15 }
 0xd38   : > { %v1794_v17 = vmul.f32 %v1793_v16, %v1793_v16 }
 0xd3a   : > { %v1795_v18 = vsel %vm533_vm1, %v1794_v17, 0.0 }
 0xd3b   : > { %1796 = vadd.xlane.f32.xlu1 %v1795_v18 }
 0xdc4   : > { %v1797_v19 = vpop.xlane.xlu1 %1796 }
 0xdc5   : > { %v1798_v20 = vmul.f32 0.03125, %v1797_v19 }
 0xdc7   : > { %v1799_v21 = vadd.f32 1e-12, %v1798_v20 }
 0xdc9   : > { %2192 = vrsqrt.f32 %v1799_v21 }
 0xdd6   : > { %v2193_v22 = vpop.eup %2192 }
 0xdd7   : > { %v1801_v24 = vmul.f32 %v2193_v22, %v1793_v16 }
 0xdd9   : > { %v1808_v14 = vmul.f32 %v1960_v23, %v1801_v24 }
 0xddb   : > { %v1815_v26 = vadd.f32 %v1961_v25, %v1808_v14 }
 0xddd   : > { %1816 = vst.msk [vmem:[%s519_s24] sm:$0xff] %vm533_vm1, %v1815_v26 }
 0xdde   : > { %2263 = shalt.err (!%p2260_p5)
}
 0xddf   : > { %s2264_s21 = scalar_lea.hbm %s1829_s14, 128  ;;  %s2268_s29 = scalar_lea.hbm %s2859_s0, 256 }
 0xde0   : > { %p2265_p9 = scmp.ne.s32.totalorder %s1829_s14, %s2264_s21  ;;  %p2269_p12 = scmp.lt.s32.totalorder %s1829_s14, %s2859_s0 }
 0xde1   : > { %p2270_p1 = scmp.lt.s32.totalorder %s2268_s29, %s2264_s21 }
 0xde2   : > { %p2266_p0 = pnand %p2265_p9, %p2860_p3 }
 0xde3   : > { %p2271_p6 = por %p2270_p1, %p2269_p12 }
 0xde4   : > { %p2267_p11 = pneg %p2266_p0 }
 0xde6   : > { %p2272_p13 = pnand %p2271_p6, %p2267_p11 }
 0xde8   : > { %2275 = shalt.err (!%p2272_p13)
}
 0xde9   : > { %2114 = dma.vmem_to_hbm [thread:$0]  (%p2860_p3), %s1832_s18, 128, %s1829_s14, %s1818_s13  }
 0xdea PF: > { %s2861_s27 = sld [smem:[#allocation11_spill]]  ;;  %p2864_p8 = scmp.ge.s32.totalorder %s2318_s16, 2 }
 0xdeb   : > { %s2862_s19 = sld [smem:[#allocation15_spill]] }
 0xdf0   : > { %s1843_s15 = sand.u32 1, %s2861_s27  }
 0xdf1   : > { %p2863_p7 = scmp.ne.s32.totalorder %s2862_s19, 0  ;;  %s1844_s20 = scalar_lea.sflag [#allocation4], %s1843_s15 }
 0xdf3   : > { %p2124_p10 = pnand %p2864_p8, %p2863_p7 }
 0xdf5   : > { %p2125_p2 = pneg %p2124_p10 }
 0xdf7   : > { %2301 = dma.done.wait (%p2125_p2), %s1844_s20, 128  }
 0xdf8   : > { %2303 = vsyncadd (%p2125_p2), %s1844_s20, 4294967168  ;;  %s2865_s16 = sld [smem:[#allocation13_spill]]  ;;  %s2868_s29 = smov %s2310_s30 }
 0xdf9   : > { %s2866_s26 = sld [smem:[#allocation12_spill]] }
 0xdfa   : > { %s2867_s15 = sld [smem:[#allocation14_spill]] }
 0xdfe   : > { %p30_p4 = scmp.ge.s32.totalorder %s2865_s16, 4  }
 0xdff   : > { %s2869_s30 = smov %s2866_s26 }
 0xe00   :  { %32 = sbr.rel (!%p30_p4) target bundleno = 11 (0xb), region = 134 }
 0xe05   :  { %1849 = vsyncpa [#allocation3], 1 }
 0xe06   :  { %1851 = vsyncpa [#allocation3 + $0x1], 1 }
 0xe07   :  { %1852 = vsyncpa [#allocation6], 1 }
 0xe08   :  { %1854 = vsyncpa [#allocation6 + $0x1], 1 }
 0xe09   :  { %1855 = vsyncpa [#allocation4], 1 }
 0xe0a   :  { %1857 = vsyncpa [#allocation4 + $0x1], 1 }

</bundles_post_ra>
